<compile_context>
chip_gen: v7x
topology: tpu7x:2x2x1
jax: 0.10.0
libtpu: 0.0.40
codegen_flags: <defaults>
</compile_context>

<pallas_src>
import jax
import jax.numpy as jnp
from jax.experimental import pallas as pl
from jax.experimental.pallas import tpu as pltpu


def _attention_kernel(enc_ref, att2_ref, we_ref, be_ref, ctx_ref, alpha_ref):
    BT, N, E = enc_ref.shape
    A = we_ref.shape[1]

    enc = enc_ref[...]                                        # (BT, N, E)

    # ---- encoder_att: one large MXU matmul over all BT*N pixel rows -------
    enc_flat = enc.reshape(BT * N, E)                         # leading-dim merge (layout no-op)
    att1 = jnp.dot(enc_flat, we_ref[...],
                   preferred_element_type=jnp.float32) + be_ref[...]   # (BT*N, A)
    att1 = att1.reshape(BT, N, A)                             # leading-dim split (layout no-op)

    # ---- add precomputed decoder projection, ReLU --------------------------
    att2 = att2_ref[...]                                      # (BT, A)
    e = jnp.maximum(att1 + att2[:, None, :], 0.0)             # (BT, N, A)

    # ---- score per pixel ----------------------------------------------------
    # TODO(synk): original module likely had a full_att Linear(A, 1) score
    # projection; it is absent from __init__, so we use an unweighted sum.
    scores = jnp.sum(e, axis=-1, keepdims=True)               # (BT, N, 1)

    # ---- softmax over pixels (torch Softmax(dim=1)), per batch element -----
    m = jnp.max(scores, axis=1, keepdims=True)                # (BT, 1, 1)
    p = jnp.exp(scores - m)                                   # (BT, N, 1)
    denom = jnp.sum(p, axis=1, keepdims=True)                 # (BT, 1, 1)
    alpha = p * pl.reciprocal(denom, approx=True)             # (BT, N, 1) (EUP recip)

    # ---- context: alpha-weighted sum of encoder features (MXU, batched) ----
    alpha_t = jnp.swapaxes(alpha, 1, 2)                       # (BT, 1, N)
    ctx = jnp.einsum('bon,bne->boe', alpha_t, enc.astype(jnp.float32),
                     preferred_element_type=jnp.float32)      # (BT, 1, E)

    ctx_ref[...] = ctx[:, 0, :].astype(ctx_ref.dtype)         # (BT, E)
    alpha_ref[...] = alpha_t[:, 0, :].astype(alpha_ref.dtype)  # (BT, N) lane-dense


def _choose_block_batch(B, N, E, itemsize, *, target_rows=256,
                        vmem_budget_bytes=32 * 1024 * 1024):
    """How many batch elements to process per grid step.

    Grow BT until BT*N reaches ~256 MXU rows (v6e/v7x MXU width) while the
    double-buffered encoder block stays inside the VMEM budget. Keep the
    second-to-last block dim legal (multiple of 8 or the full batch dim).
    """
    divisors = [d for d in range(1, B + 1) if B % d == 0]
    aligned = [d for d in divisors if d == B or d % 8 == 0] or divisors
    bt = aligned[0]
    for d in aligned:
        if 2 * d * N * E * itemsize > vmem_budget_bytes:      # double-buffered enc block
            break
        bt = d
        if d * N >= target_rows:                              # enough MXU rows
            break
    return bt


def attention_module(encoder_out, decoder_hidden, w_enc, b_enc, w_dec, b_dec):
    """encoder_out: (B, N, E); decoder_hidden: (B, D).
    w_enc: (E, A), b_enc: (A,), w_dec: (D, A), b_dec: (A,).
    Returns (context (B, E), alpha (B, N) float32)."""
    B, N, E = encoder_out.shape
    A = w_enc.shape[1]

    # decoder_att hoisted out of the kernel: a single full-batch XLA GEMM.
    att2 = (decoder_hidden @ w_dec + b_dec).astype(jnp.float32)   # (B, A)
    b_enc2 = b_enc.reshape(1, A).astype(jnp.float32)

    bt = _choose_block_batch(B, N, E, encoder_out.dtype.itemsize)
    grid = (B // bt,)
    # TODO(synk): for very large N the whole (bt, N, E) slab + full softmax
    # must fit VMEM; an online-softmax two-pass variant would be needed then.

    out_shapes = (
        jax.ShapeDtypeStruct((B, E), encoder_out.dtype),
        jax.ShapeDtypeStruct((B, N), jnp.float32),
    )

    grid_spec = pltpu.PrefetchScalarGridSpec(
        num_scalar_prefetch=0,
        grid=grid,
        in_specs=[
            pl.BlockSpec((bt, N, E), lambda b: (b, 0, 0)),   # encoder_out tile
            pl.BlockSpec((bt, A), lambda b: (b, 0)),         # precomputed att2
            pl.BlockSpec((E, A), lambda b: (0, 0)),          # W_enc (resident)
            pl.BlockSpec((1, A), lambda b: (0, 0)),          # b_enc
        ],
        out_specs=[
            pl.BlockSpec((bt, E), lambda b: (b, 0)),         # context
            pl.BlockSpec((bt, N), lambda b: (b, 0)),         # alpha (lane-dense)
        ],
    )

    flops = int(2 * B * N * E * A + 2 * B * N * E + 4 * B * N * A)
    bytes_accessed = int(4 * (B * N * E + B * A + E * A + A + B * E + B * N))
    cost = pl.CostEstimate(flops=flops, transcendentals=int(B * N),
                           bytes_accessed=bytes_accessed)

    return pl.pallas_call(
        _attention_kernel,
        out_shape=out_shapes,
        grid_spec=grid_spec,
        cost_estimate=cost,
        compiler_params=pltpu.CompilerParams(
            dimension_semantics=("parallel",),
            vmem_limit_bytes=48 * 1024 * 1024,
        ),
    )(encoder_out, att2, w_enc, b_enc2)


def _reference(encoder_out, decoder_hidden, w_enc, b_enc, w_dec, b_dec):
    att1 = encoder_out @ w_enc + b_enc                       # (B, N, A)
    att2 = decoder_hidden @ w_dec + b_dec                    # (B, A)
    e = jnp.maximum(att1 + att2[:, None, :], 0.0)            # (B, N, A)
    scores = e.sum(-1)                                       # (B, N)
    alpha = jax.nn.softmax(scores, axis=1)                   # (B, N)
    ctx = (encoder_out * alpha[:, :, None]).sum(axis=1)      # (B, E)
    return ctx, alpha


if __name__ == "__main__":
    # small shapes consistent with the module
    B, N, E, D, A = 2, 8, 32, 32, 32
    key = jax.random.PRNGKey(0)
    k1, k2, k3, k4, k5, k6 = jax.random.split(key, 6)

    encoder_out = jax.random.normal(k1, (B, N, E), dtype=jnp.float32)
    decoder_hidden = jax.random.normal(k2, (B, D), dtype=jnp.float32)

    # Linear weights stored in (in, out) layout used by x @ W
    w_enc = jax.random.normal(k3, (E, A), dtype=jnp.float32) * 0.1
    b_enc = jax.random.normal(k4, (A,), dtype=jnp.float32) * 0.1
    w_dec = jax.random.normal(k5, (D, A), dtype=jnp.float32) * 0.1
    b_dec = jax.random.normal(k6, (A,), dtype=jnp.float32) * 0.1

    ctx, alpha = attention_module(encoder_out, decoder_hidden,
                                  w_enc, b_enc, w_dec, b_dec)
    jax.block_until_ready(ctx)
    jax.block_until_ready(alpha)

    ctx_ref, alpha_ref = _reference(encoder_out, decoder_hidden,
                                    w_enc, b_enc, w_dec, b_dec)
    # approx=True EUP reciprocal in the softmax denom -> compare at ~1e-3
    assert jnp.allclose(ctx, ctx_ref, atol=2e-3, rtol=2e-3)
    assert jnp.allclose(alpha, alpha_ref, atol=2e-3, rtol=2e-3)

    print("KERNEL_OK")
</pallas_src>

<mosaic_0001>
module attributes {stable_mosaic.version = 11 : i64} {
  func.func @_attention_kernel(%arg0: i32, %arg1: memref<2x8x32xf32, #tpu.memory_space<vmem>>, %arg2: memref<2x32xf32, #tpu.memory_space<vmem>>, %arg3: memref<32x32xf32, #tpu.memory_space<vmem>>, %arg4: memref<1x32xf32, #tpu.memory_space<vmem>>, %arg5: memref<2x32xf32, #tpu.memory_space<vmem>>, %arg6: memref<2x8xf32, #tpu.memory_space<vmem>>) attributes {dimension_semantics = [#tpu.dimension_semantics<parallel>], iteration_bounds = array<i64: 1>, scalar_prefetch = 0 : i64, scratch_operands = 0 : i64, tpu.core_type = #tpu.core_type<tc>, window_params = [{transform_indices = @transform_0, window_bounds = array<i64: 2, 8, 32>}, {transform_indices = @transform_1, window_bounds = array<i64: 2, 32>}, {pipeline_mode = #tpu.pipeline_mode<synchronous>, transform_indices = @transform_2, window_bounds = array<i64: 32, 32>}, {pipeline_mode = #tpu.pipeline_mode<synchronous>, transform_indices = @transform_3, window_bounds = array<i64: 1, 32>}, {transform_indices = @transform_4, window_bounds = array<i64: 2, 32>}, {transform_indices = @transform_5, window_bounds = array<i64: 2, 8>}]} {
    %c0 = arith.constant 0 : index
    %c0_0 = arith.constant 0 : index
    %c0_1 = arith.constant 0 : index
    %0 = vector.load %arg1[%c0, %c0_0, %c0_1] : memref<2x8x32xf32, #tpu.memory_space<vmem>>, vector<2x8x32xf32>
    %1 = vector.shape_cast %0 : vector<2x8x32xf32> to vector<16x32xf32>
    %c0_2 = arith.constant 0 : index
    %c0_3 = arith.constant 0 : index
    %2 = vector.load %arg3[%c0_2, %c0_3] : memref<32x32xf32, #tpu.memory_space<vmem>>, vector<32x32xf32>
    %cst = arith.constant dense<0.000000e+00> : vector<16x32xf32>
    %3 = tpu.matmul %1, %2, %cst {dimension_numbers = #tpu.dot_dimension_numbers<[1], [0], [0], [1], [0, 0, 1, 1], [], []>} : vector<16x32xf32>, vector<32x32xf32>, vector<16x32xf32> -> vector<16x32xf32>
    %c0_4 = arith.constant 0 : index
    %c0_5 = arith.constant 0 : index
    %4 = vector.load %arg4[%c0_4, %c0_5] : memref<1x32xf32, #tpu.memory_space<vmem>>, vector<1x32xf32>
    %5 = vector.broadcast %4 : vector<1x32xf32> to vector<16x32xf32>
    %6 = arith.addf %3, %5 : vector<16x32xf32>
    %7 = vector.shape_cast %6 : vector<16x32xf32> to vector<2x8x32xf32>
    %c0_6 = arith.constant 0 : index
    %c0_7 = arith.constant 0 : index
    %8 = vector.load %arg2[%c0_6, %c0_7] : memref<2x32xf32, #tpu.memory_space<vmem>>, vector<2x32xf32>
    %9 = vector.shape_cast %8 : vector<2x32xf32> to vector<2x1x32xf32>
    %10 = vector.broadcast %9 : vector<2x1x32xf32> to vector<2x8x32xf32>
    %11 = arith.addf %7, %10 : vector<2x8x32xf32>
    %cst_8 = arith.constant 0.000000e+00 : f32
    %12 = vector.broadcast %cst_8 : f32 to vector<2x8x32xf32>
    %13 = arith.maximumf %11, %12 : vector<2x8x32xf32>
    %cst_9 = arith.constant dense<0.000000e+00> : vector<2x8xf32>
    %14 = vector.multi_reduction <add>, %13, %cst_9 [2] : vector<2x8x32xf32> to vector<2x8xf32>
    %15 = vector.shape_cast %14 : vector<2x8xf32> to vector<2x8x1xf32>
    %cst_10 = arith.constant dense<0xFF800000> : vector<2x1xf32>
    %16 = vector.multi_reduction <maximumf>, %15, %cst_10 [1] : vector<2x8x1xf32> to vector<2x1xf32>
    %17 = vector.shape_cast %16 : vector<2x1xf32> to vector<2x1x1xf32>
    %18 = vector.broadcast %17 : vector<2x1x1xf32> to vector<2x8x1xf32>
    %19 = arith.subf %15, %18 : vector<2x8x1xf32>
    %20 = math.exp %19 : vector<2x8x1xf32>
    %cst_11 = arith.constant dense<0.000000e+00> : vector<2x1xf32>
    %21 = vector.multi_reduction <add>, %20, %cst_11 [1] : vector<2x8x1xf32> to vector<2x1xf32>
    %22 = vector.shape_cast %21 : vector<2x1xf32> to vector<2x1x1xf32>
    %23 = tpu.reciprocal %22 {approx = true} : vector<2x1x1xf32> -> vector<2x1x1xf32>
    %24 = vector.broadcast %23 : vector<2x1x1xf32> to vector<2x8x1xf32>
    %25 = arith.mulf %20, %24 : vector<2x8x1xf32>
    %26 = tpu.transpose %25, [0, 2, 1] : vector<2x8x1xf32> -> vector<2x1x8xf32>
    "tpu.trace_start"() <{level = 10 : i32, message = "bon,bne->boe"}> : () -> ()
    %cst_12 = arith.constant dense<0.000000e+00> : vector<2x1x32xf32>
    %27 = tpu.matmul %26, %0, %cst_12 {dimension_numbers = #tpu.dot_dimension_numbers<[2], [1], [1], [2], [0, 0, 0, 1, 1, 2], [0], [0]>} : vector<2x1x8xf32>, vector<2x8x32xf32>, vector<2x1x32xf32> -> vector<2x1x32xf32>
    "tpu.trace_stop"() : () -> ()
    %28 = vector.shape_cast %27 : vector<2x1x32xf32> to vector<2x32xf32>
    %c0_13 = arith.constant 0 : index
    %c0_14 = arith.constant 0 : index
    %29 = vector.load %arg5[%c0_13, %c0_14] : memref<2x32xf32, #tpu.memory_space<vmem>>, vector<2x32xf32>
    tpu.vector_store %arg5[%c0_13, %c0_14], %28 {strides = array<i32>} : memref<2x32xf32, #tpu.memory_space<vmem>>, vector<2x32xf32>,
    %30 = vector.shape_cast %26 : vector<2x1x8xf32> to vector<2x8xf32>
    %c0_15 = arith.constant 0 : index
    %c0_16 = arith.constant 0 : index
    %31 = vector.load %arg6[%c0_15, %c0_16] : memref<2x8xf32, #tpu.memory_space<vmem>>, vector<2x8xf32>
    tpu.vector_store %arg6[%c0_15, %c0_16], %30 {strides = array<i32>} : memref<2x8xf32, #tpu.memory_space<vmem>>, vector<2x8xf32>,
    return
  }
  func.func @transform_0(%arg0: i32) -> (i32, i32, i32) {
    %c0_i32 = arith.constant 0 : i32
    %c0_i32_0 = arith.constant 0 : i32
    %c0_i32_1 = arith.constant 0 : i32
    return %arg0, %c0_i32, %c0_i32_0 : i32, i32, i32
  }
  func.func @transform_1(%arg0: i32) -> (i32, i32) {
    %c0_i32 = arith.constant 0 : i32
    %c0_i32_0 = arith.constant 0 : i32
    return %arg0, %c0_i32 : i32, i32
  }
  func.func @transform_2(%arg0: i32) -> (i32, i32) {
    %c0_i32 = arith.constant 0 : i32
    %c0_i32_0 = arith.constant 0 : i32
    %c0_i32_1 = arith.constant 0 : i32
    return %c0_i32, %c0_i32_0 : i32, i32
  }
  func.func @transform_3(%arg0: i32) -> (i32, i32) {
    %c0_i32 = arith.constant 0 : i32
    %c0_i32_0 = arith.constant 0 : i32
    %c0_i32_1 = arith.constant 0 : i32
    return %c0_i32, %c0_i32_0 : i32, i32
  }
  func.func @transform_4(%arg0: i32) -> (i32, i32) {
    %c0_i32 = arith.constant 0 : i32
    %c0_i32_0 = arith.constant 0 : i32
    return %arg0, %c0_i32 : i32, i32
  }
  func.func @transform_5(%arg0: i32) -> (i32, i32) {
    %c0_i32 = arith.constant 0 : i32
    %c0_i32_0 = arith.constant 0 : i32
    return %arg0, %c0_i32 : i32, i32
  }
}

</mosaic_0001>

<bundles_post_ra>
// kernel: tpu_custom_call.1
= control target key start
LH: loop header
LB: loop body
LE: loop exit
PB: predicated region body
PF: predicated region fallthrough
CT: control target
= control target key end

     0   :  { %11 = vsyncpa [#allocation3], 0  ;;  %s739_s0 = inlined_call_operand.hbm [shape: f32[2,8,32], index: 0, kind: input, shape index: {}]   ;;  %s740_s1 = inlined_call_operand.vmem [shape: f32[2,32], index: 1, kind: input, shape index: {}]   ;;  %s741_s2 = inlined_call_operand.hbm [shape: f32[32,32], index: 2, kind: input, shape index: {}]   ;;  %s742_s3 = inlined_call_operand.vmem [shape: f32[1,32], index: 3, kind: input, shape index: {}]   ;;  %s743_s4 = inlined_call_operand.hbm [shape: f32[2,32], index: 4, kind: output, shape index: {0}]   ;;  %s744_s5 = inlined_call_operand.hbm [shape: f32[2,8], index: 5, kind: output, shape index: {1}]  }
   0x1   :  { %12 = vsyncpa [#allocation6], 0 }
   0x2   :  { %13 = vsyncpa [#allocation4], 0 }
   0x3   :  { %14 = vsyncpa [#allocation9], 0  ;;  %s634_s18 = smov [#allocation2]   ;;  %s538_s22 = scalar_lea.hbm %s739_s0, 256 }
   0x4   :  { %s20_s19 = sshll.u32 %s634_s18, 4  ;;  %p539_p0 = scmp.ne.s32.totalorder %s739_s0, %s538_s22  ;;  %s21_s19 = int_to_ptr.vmem [resolvable:$true] %s20_s19 }
   0x5   :  { %p542_p1 = scmp.lt.u32.totalorder %s538_s22, %s739_s0 }
   0x7   :  { %p544_p2 = pnand %p542_p1, %p539_p0 }
   0x9   :  { %547 = shalt.err (!%p544_p2)
}
   0xa   :  { %s548_s27 = scalar_lea.vmem %s21_s19, 256  ;;  %p553_p4 = scmp.lt.s32.totalorder %s21_s19, %s21_s19 }
   0xb   :  { %p549_p3 = scmp.ne.s32.totalorder %s21_s19, %s548_s27  ;;  %p554_p5 = scmp.lt.s32.totalorder %s548_s27, %s548_s27 }
   0xd   :  { %p555_p6 = por %p554_p5, %p553_p4 }
   0xf   :  { %p556_p7 = pnand %p555_p6, %p549_p3 }
  0x11   :  { %559 = shalt.err (!%p556_p7)
}
  0x12   :  { %s635_s28 = smov 128   ;;  %s636_s29 = smov 8  }
  0x13   :  { %26 = dma.hbm_to_vmem [thread:$0]  %s739_s0, 256, %s21_s19, [#allocation3], %s635_s28, %s635_s28, %s636_s29  }
  0x14   :  { %s637_s7 = smov [#allocation5]   ;;  %s560_s11 = scalar_lea.hbm %s741_s2, 512 }
  0x15   :  { %s34_s8 = sshll.u32 %s637_s7, 4  ;;  %p561_p8 = scmp.ne.s32.totalorder %s741_s2, %s560_s11  ;;  %s35_s8 = int_to_ptr.vmem [resolvable:$true] %s34_s8 }
  0x16   :  { %p564_p9 = scmp.lt.u32.totalorder %s560_s11, %s741_s2 }
  0x18   :  { %p566_p10 = pnand %p564_p9, %p561_p8 }
  0x1a   :  { %569 = shalt.err (!%p566_p10)
}
  0x1b   :  { %s570_s16 = scalar_lea.vmem %s35_s8, 512  ;;  %p575_p12 = scmp.lt.s32.totalorder %s35_s8, %s35_s8 }
  0x1c   :  { %p571_p11 = scmp.ne.s32.totalorder %s35_s8, %s570_s16  ;;  %p576_p13 = scmp.lt.s32.totalorder %s570_s16, %s570_s16 }
  0x1e   :  { %p577_p0 = por %p576_p13, %p575_p12 }
  0x20   :  { %p578_p1 = pnand %p577_p0, %p571_p11 }
  0x22   :  { %581 = shalt.err (!%p578_p1)
}
  0x23   :  { %40 = dma.hbm_to_vmem [thread:$0]  %s741_s2, 512, %s35_s8, [#allocation6], %s635_s28, %s635_s28, %s636_s29  }
  0x24   :  { %626 = dma.done.wait [#allocation3], 256  }
  0x25   :  { %627 = vsyncadd [#allocation3], 4294967040 }
  0x26   :  { %628 = dma.done.wait [#allocation6], 512  }
  0x27   :  { %629 = vsyncadd [#allocation6], 4294966784  ;;  %vm62_vm0 = vcmask 261120   ;;  %v51_v0 = vld [vmem:[#allocation5] sm:$0xff]  ;;  %v52_v1 = vld [vmem:[#allocation5 + $0x8] sm:$0xff]  ;;  %v157_v10 = vlaneseq  ;;  %v639_v32 = vmov 0.0  }
  0x28   :  { %v53_v2 = vld [vmem:[#allocation5 + $0x10] sm:$0xff]  ;;  %v513_v3 = vpack.c.bf16 %v52_v1, %v51_v0  ;;  %v54_v4 = vld [vmem:[#allocation5 + $0x18] sm:$0xff]  ;;  %v638_v8 = vmov 1966171168   ;;  %503 = vmatprep.subr.mxu1 %v639_v32  ;;  %vm640_vm1 = vmmov 0   ;;  %vm286_vm2 = vcmask 64512  }
  0x29   :  { %v49_v5 = vld [vmem:[#allocation2] sm:$0xff]  ;;  %v517_v6 = vpack.c.bf16 %v54_v4, %v53_v2  ;;  %v698_v7 = vld [vmem:[#allocation2 + $0x8] sm:$0xff]  ;;  %v155_v9 = vunpack.c.l.s4 %v638_v8  ;;  %v158_v12 = vshrl.u32 %v157_v10, 7  ;;  %505 = vmatprep.mubr.msk.f32.mxu1 %vm640_vm1, %v639_v32  ;;  %vm436_vm3 = vcmask 1041409  }
  0x2a   :  { %500 = vmatprep.mubr.msk.f32.mxu0 %vm62_vm0, %v49_v5  ;;  %514 = vmatprep.subr.bf16.mxu0 %v513_v3  ;;  %v479_v13 = vld.sshfl [vmem:[%s740_s1] sm:$0x11 pattern:$0x75316420]  ;;  %vm444_vm4 = vcmask 58368   ;;  %s641_s1 = smov [#allocation8]  }
  0x2b   :  { %516 = vmatpush3.bf16.msra.mxu0 %v513_v3  ;;  %v156_v11 = vunpack.c.0.s8 %v155_v9  ;;  %v153_v14 = vcombine.high %v479_v13, %v479_v13  ;;  %v170_v17 = vsub.s32 0, %v158_v12  ;;  %v476_v19 = vld [vmem:[%s742_s3] ss:$0 sm:$0xff]  ;;  %504 = vmatpush3.msra.mxu1 %v49_v5  ;;  %s462_s3 = sshll.u32 %s641_s1, 4  ;;  %s463_s3 = int_to_ptr.vmem [resolvable:$true] %s462_s3 }
  0x2c   :  { %518 = vmatprep.subr.bf16.mxu0 %v517_v6  ;;  %508 = vmatprep.subr.mxu1 %v639_v32  ;;  %s582_s21 = scalar_lea.vmem %s463_s3, 32  ;;  %p587_p3 = scmp.lt.s32.totalorder %s463_s3, %s463_s3 }
  0x2d   :  { %v159_v15 = vsub.s32 %v156_v11, %v158_v12  ;;  %p583_p2 = scmp.ne.s32.totalorder %s463_s3, %s582_s21  ;;  %p588_p4 = scmp.lt.s32.totalorder %s582_s21, %s582_s21 }
  0x2f   :  { %520 = vmatpush3.bf16.msra.mxu0 %v517_v6  ;;  %v167_v16 = vrot.slane %v153_v14, %v159_v15  ;;  %v160_v18 = vrot.slane %v479_v13, %v159_v15  ;;  %p589_p5 = por %p588_p4, %p587_p3 }
  0x31   :  { %v175_v21 = vrot.slane %v167_v16, %v170_v17  ;;  %v171_v22 = vrot.slane %v160_v18, %v170_v17  ;;  %p590_p6 = pnand %p589_p5, %p583_p2 }
  0x32   :  { %501 = vmatmul.mubr.msk.f32.vlgmr.msra.gmra.mrb[0].mxu0 %vm62_vm0, %v698_v7 }
 0x105   :  { %v502_v20 = vpop.f32.mrb[0].mxu0 }
 0x106   :  { %v141_v23 = vadd.f32 %v502_v20, %v476_v19  ;;  %v135_v24 = vpop.f32.mrb[1].mxu0 }
 0x107   :  { %v136_v25 = vadd.f32 %v476_v19, %v135_v24 }
 0x108   :  { %v179_v26 = vadd.f32 %v175_v21, %v141_v23 }
 0x109   :  { %v178_v27 = vadd.f32 %v171_v22, %v136_v25 }
 0x10a   :  { %v181_v30 = vmax.f32 %v179_v26, 0.0 }
 0x10b   :  { %v180_v28 = vmax.f32 %v178_v27, 0.0 }
 0x10c   :  { %v185_v31 = vsel %vm62_vm0, %v181_v30, 0.0 }
 0x10d   :  { %v182_v29 = vsel %vm62_vm0, %v180_v28, 0.0 }
 0x10e   :  { %183 = vadd.xlane.f32.xlu0 %v182_v29 }
 0x112   :  { %186 = vadd.xlane.f32.xlu0 %v185_v31 }
 0x19b   :  { %v184_v33 = vpop.xlane.xlu0 %183 }
 0x19c   :  { %v188_v34 = vrot.slane %v184_v33, 4 }
 0x19e   :  { %v189_v35 = vmax.f32 %v184_v33, %v188_v34 }
 0x19f   :  { %v187_v36 = vpop.xlane.xlu0 %186 }
 0x1a0   :  { %v190_v37 = vrot.slane %v189_v35, 2  ;;  %v194_v38 = vrot.slane %v187_v36, 4 }
 0x1a2   :  { %v191_v39 = vmax.f32 %v189_v35, %v190_v37  ;;  %v195_v40 = vmax.f32 %v187_v36, %v194_v38 }
 0x1a4   :  { %v192_v41 = vrot.slane %v191_v39, 1  ;;  %v196_v42 = vrot.slane %v195_v40, 2 }
 0x1a6   :  { %v193_v43 = vmax.f32 %v191_v39, %v192_v41  ;;  %v197_v44 = vmax.f32 %v195_v40, %v196_v42 }
 0x1a8   :  { %v200_v45 = vsub.f32 %v184_v33, %v193_v43  ;;  %v198_v46 = vrot.slane %v197_v44, 1 }
 0x1aa   :  { %v202_v47 = vmul.f32 1.442695, %v200_v45  ;;  %v199_v48 = vmax.f32 %v197_v44, %v198_v46 }
 0x1ac   :  { %530 = vpow2.f32 %v202_v47  ;;  %v201_v49 = vsub.f32 %v187_v36, %v199_v48 }
 0x1ae   :  { %v204_v50 = vmul.f32 1.442695, %v201_v49 }
 0x1b0   :  { %532 = vpow2.f32 %v204_v50 }
 0x1b6   :  { %v531_v51 = vpop.eup %530 }
 0x1b7   :  { %v206_v52 = vrot.slane %v531_v51, 4 }
 0x1b9   :  { %v207_v53 = vadd.f32 %v531_v51, %v206_v52 }
 0x1ba   :  { %v533_v54 = vpop.eup %532 }
 0x1bb   :  { %v208_v55 = vrot.slane %v207_v53, 2  ;;  %v212_v56 = vrot.slane %v533_v54, 4 }
 0x1bd   :  { %v209_v57 = vadd.f32 %v208_v55, %v207_v53  ;;  %v213_v58 = vadd.f32 %v533_v54, %v212_v56 }
 0x1bf   :  { %v210_v59 = vrot.slane %v209_v57, 1  ;;  %v214_v60 = vrot.slane %v213_v58, 2 }
 0x1c1   :  { %v211_v61 = vadd.f32 %v210_v59, %v209_v57  ;;  %v215_v62 = vadd.f32 %v214_v60, %v213_v58 }
 0x1c3   :  { %534 = vrcp.f32 %v211_v61  ;;  %v216_v63 = vrot.slane %v215_v62, 1 }
 0x1c5   :  { %v217_v0 = vadd.f32 %v216_v63, %v215_v62 }
 0x1c7   :  { %536 = vrcp.f32 %v217_v0 }
 0x1cd   :  { %v535_v1 = vpop.eup %534 }
 0x1ce   :  { %v220_v2 = vmul.f32 %v535_v1, %v531_v51 }
 0x1d0   :  { %222 = vxpose.xlu1.b32.start.end [1/1] (short) (narrow) %v220_v2, 8 }
 0x1d1   :  { %v537_v3 = vpop.eup %536 }
 0x1d2   :  { %v221_v4 = vmul.f32 %v537_v3, %v533_v54 }
 0x1d4   :  { %254 = vxpose.xlu1.b32.start.end [1/1] (short) (narrow) %v221_v4, 8 }
 0x250   :  { %v238_v5 = vpop.trf.xlu1 }
 0x251   :  { %506 = vmatmul.mubr.msk.f32.vlgmr.msra.gmra.mrb[0].mxu1 %vm286_vm2, %v238_v5 }
 0x252   :  { %509 = vmatpush3.msra.mxu1 %v698_v7  ;;  %510 = vmatprep.mubr.msk.f32.mxu1 %vm640_vm1, %v639_v32 }
 0x254   :  { %v270_v6 = vpop.trf.xlu1 }
 0x255   :  { %v441_v8 = vrot.slane %v270_v6, 7  ;;  %511 = vmatmul.mubr.msk.f32.vlgmr.msra.gmra.mrb[2].mxu1 %vm286_vm2, %v270_v6 }
 0x257   :  { %v442_v9 = vsel %vm436_vm3, %v441_v8, %v238_v5 }
 0x258   :  { %445 = vst.msk [vmem:[#allocation8] sm:$0x3] %vm444_vm4, %v442_v9 }
 0x259   :  { %593 = shalt.err (!%p590_p6)
}
 0x25a   :  { %s594_s24 = scalar_lea.hbm %s744_s5, 32 }
 0x25b   :  { %p595_p7 = scmp.ne.s32.totalorder %s744_s5, %s594_s24  ;;  %p598_p8 = scmp.lt.u32.totalorder %s594_s24, %s744_s5 }
 0x25d   :  { %p600_p9 = pnand %p598_p8, %p595_p7 }
 0x25f   :  { %603 = shalt.err (!%p600_p9)
}
 0x260   :  { %465 = dma.vmem_to_hbm [thread:$0]  %s463_s3, 32, %s744_s5, [#allocation9]   ;;  %vm439_vm5 = vcmask 254976  }
 0x261   :  { %s642_s6 = smov [#allocation7]  }
 0x262   :  { %s452_s7 = sshll.u32 %s642_s6, 4  ;;  %s453_s7 = int_to_ptr.vmem [resolvable:$true] %s452_s7 }
 0x263   :  { %s604_s8 = scalar_lea.vmem %s453_s7, 32  ;;  %p609_p11 = scmp.lt.s32.totalorder %s453_s7, %s453_s7 }
 0x264   :  { %p605_p10 = scmp.ne.s32.totalorder %s453_s7, %s604_s8  ;;  %p610_p12 = scmp.lt.s32.totalorder %s604_s8, %s604_s8 }
 0x266   :  { %p611_p13 = por %p610_p12, %p609_p11 }
 0x268   :  { %p612_p0 = pnand %p611_p13, %p605_p10 }
 0x324   :  { %v356_v7 = vpop.f32.mrb[0].mxu1 }
 0x325   :  { %v507_v10 = vpop.f32.mrb[1].mxu1 }
 0x328   :  { %v429_v11 = vpop.f32.mrb[2].mxu1 }
 0x329   :  { %v435_v12 = vrot.slane %v429_v11, 7  ;;  %v512_v13 = vpop.f32.mrb[3].mxu1 }
 0x32b   :  { %v437_v14 = vsel %vm436_vm3, %v435_v12, %v356_v7 }
 0x32c   :  { %440 = vst.msk [vmem:[#allocation7] sm:$0x3] %vm439_vm5, %v437_v14 }
 0x32d   :  { %615 = shalt.err (!%p612_p0)
}
 0x32e   :  { %s616_s10 = scalar_lea.hbm %s743_s4, 32 }
 0x32f   :  { %p617_p1 = scmp.ne.s32.totalorder %s743_s4, %s616_s10  ;;  %p620_p2 = scmp.lt.u32.totalorder %s616_s10, %s743_s4 }
 0x331   :  { %p622_p3 = pnand %p620_p2, %p617_p1 }
 0x333   :  { %625 = shalt.err (!%p622_p3)
}
 0x334   :  { %455 = dma.vmem_to_hbm [thread:$0]  %s453_s7, 32, %s743_s4, [#allocation4]  }
 0x335   :  { %630 = dma.done.wait [#allocation4], 32  }
 0x336   :  { %631 = vsyncadd [#allocation4], 4294967264 }
 0x337   :  { %632 = dma.done.wait [#allocation9], 32  }
 0x338   :  { %633 = vsyncadd [#allocation9], 4294967264 }
 0x339   :  { %472 = vsyncpa [#allocation3], 1 }
 0x33a   :  { %473 = vsyncpa [#allocation6], 1 }
 0x33b   :  { %474 = vsyncpa [#allocation4], 1 }
 0x33c   :  { %475 = vsyncpa [#allocation9], 1 }

</bundles_post_ra>
